<compile_context>
chip_gen: v7x
topology: tpu7x:2x2x1
jax: 0.10.0
libtpu: 0.0.40
codegen_flags: <defaults>
</compile_context>

<pallas_src>
import functools

import numpy as np
import jax
import jax.numpy as jnp
from jax.experimental import pallas as pl
from jax.experimental.pallas import tpu as pltpu

LANE = 128  # lane width of a TPU vreg


# ----------------------------- Pallas kernel -----------------------------
def _swish_kernel(x_ref, o_ref):
    x = x_ref[...].astype(jnp.float32)
    # sigmoid(x) = 0.5 * tanh(x/2) + 0.5  -> tanh goes to the EUP slot,
    # mul/add stay on the VPU; no divide, no overflow for large |x|.
    sig = 0.5 * jnp.tanh(0.5 * x) + 0.5
    o_ref[...] = (x * sig).astype(o_ref.dtype)


# ---------------------------- block selection -----------------------------
def _choose_block_rows(rows, itemsize, target_block_bytes=2 << 20):
    """~2 MiB blocks, rows a multiple of 32, and >= 2 grid steps when possible."""
    if rows < 64:
        # Single block equal to the full array dims (always a legal BlockSpec).
        return int(rows)
    br = max(32, (target_block_bytes // (LANE * itemsize)) // 32 * 32)
    # Guarantee at least 2 grid steps so the parallel axis can shard (v7x megacore).
    br = min(br, max(32, (rows // 2) // 32 * 32))
    return int(br)


def _swish_2d(x2):
    """Run the kernel over a lane-dense [rows, 128] slab."""
    rows, lanes = x2.shape
    dtype = x2.dtype
    itemsize = jnp.dtype(dtype).itemsize
    br = _choose_block_rows(rows, itemsize)
    grid = (pl.cdiv(rows, br),)

    n = rows * lanes
    cost = pl.CostEstimate(
        flops=4 * n,               # muls/adds around the tanh
        transcendentals=n,         # tanh
        bytes_accessed=2 * n * itemsize,
    )

    return pl.pallas_call(
        _swish_kernel,
        out_shape=jax.ShapeDtypeStruct((rows, lanes), dtype),
        grid=grid,
        in_specs=[pl.BlockSpec((br, lanes), lambda i: (i, 0))],
        out_specs=pl.BlockSpec((br, lanes), lambda i: (i, 0)),
        compiler_params=pltpu.CompilerParams(
            dimension_semantics=("parallel",),
        ),
        cost_estimate=cost,
    )(x2)


# ------------------------------- wrapper ---------------------------------
@jax.jit
def swish(x):
    """Elementwise Swish via a single tiled pallas_call (any shape/dtype)."""
    orig_shape = x.shape
    total = int(np.prod(orig_shape)) if len(orig_shape) else 1

    if total % LANE == 0:
        # Fast path: a contiguous row-major reshape to [rows, 128] is free
        # (no HBM pass), as is the reshape back.
        out = _swish_2d(x.reshape(total // LANE, LANE))
        return out.reshape(orig_shape)

    # Slow path (unaligned sizes only): pad the flat vector up to a multiple
    # of 128 lanes, run, then slice the valid prefix back out.
    rows = -(-total // LANE)  # ceil
    flat = jnp.ravel(x)
    flat = jnp.pad(flat, (0, rows * LANE - total))
    out = _swish_2d(flat.reshape(rows, LANE))
    return out.reshape(-1)[:total].reshape(orig_shape)


# ------------------------------ reference --------------------------------
def swish_reference(x):
    # identical math to the PyTorch module: y = x * sigmoid(x)
    xf = x.astype(jnp.float32)
    return (xf * (1.0 / (1.0 + jnp.exp(-xf)))).astype(x.dtype)


# --------------------------------- main -----------------------------------
if __name__ == "__main__":
    key = jax.random.PRNGKey(0)

    # Primary case consistent with the module's forward: [B, C, H, W].
    x = jax.random.normal(key, (2, 4, 16, 16), jnp.float32)
    y = jax.block_until_ready(swish(x))
    np.testing.assert_allclose(np.asarray(y), np.asarray(swish_reference(x)),
                               rtol=1e-5, atol=1e-6)
    assert y.shape == x.shape and y.dtype == x.dtype

    # Also exercise the unaligned (padded) path with a tiny odd shape.
    x2 = jax.random.normal(jax.random.PRNGKey(1), (3, 5, 7), jnp.float32)
    y2 = jax.block_until_ready(swish(x2))
    np.testing.assert_allclose(np.asarray(y2), np.asarray(swish_reference(x2)),
                               rtol=1e-5, atol=1e-6)
    assert y2.shape == x2.shape and y2.dtype == x2.dtype

    print("KERNEL_OK")
</pallas_src>

<mosaic_0001>
module attributes {stable_mosaic.version = 11 : i64} {
  func.func @_swish_kernel(%arg0: i32, %arg1: memref<16x128xf32, #tpu.memory_space<vmem>>, %arg2: memref<16x128xf32, #tpu.memory_space<vmem>>) attributes {dimension_semantics = [#tpu.dimension_semantics<parallel>], iteration_bounds = array<i64: 1>, scalar_prefetch = 0 : i64, scratch_operands = 0 : i64, tpu.core_type = #tpu.core_type<tc>, window_params = [{transform_indices = @transform_0, window_bounds = array<i64: 16, 128>}, {transform_indices = @transform_1, window_bounds = array<i64: 16, 128>}]} {
    %c0 = arith.constant 0 : index
    %c0_0 = arith.constant 0 : index
    %0 = vector.load %arg1[%c0, %c0_0] : memref<16x128xf32, #tpu.memory_space<vmem>>, vector<16x128xf32>
    %cst = arith.constant 5.000000e-01 : f32
    %1 = vector.broadcast %cst : f32 to vector<16x128xf32>
    %2 = arith.mulf %1, %0 : vector<16x128xf32>
    %3 = math.tanh %2 : vector<16x128xf32>
    %cst_1 = arith.constant 5.000000e-01 : f32
    %4 = vector.broadcast %cst_1 : f32 to vector<16x128xf32>
    %5 = arith.mulf %4, %3 : vector<16x128xf32>
    %cst_2 = arith.constant 5.000000e-01 : f32
    %6 = vector.broadcast %cst_2 : f32 to vector<16x128xf32>
    %7 = arith.addf %5, %6 : vector<16x128xf32>
    %8 = arith.mulf %0, %7 : vector<16x128xf32>
    %c0_3 = arith.constant 0 : index
    %c0_4 = arith.constant 0 : index
    %9 = vector.load %arg2[%c0_3, %c0_4] : memref<16x128xf32, #tpu.memory_space<vmem>>, vector<16x128xf32>
    tpu.vector_store %arg2[%c0_3, %c0_4], %8 {strides = array<i32>} : memref<16x128xf32, #tpu.memory_space<vmem>>, vector<16x128xf32>,
    return
  }
  func.func @transform_0(%arg0: i32) -> (i32, i32) {
    %c0_i32 = arith.constant 0 : i32
    %c0_i32_0 = arith.constant 0 : i32
    return %arg0, %c0_i32 : i32, i32
  }
  func.func @transform_1(%arg0: i32) -> (i32, i32) {
    %c0_i32 = arith.constant 0 : i32
    %c0_i32_0 = arith.constant 0 : i32
    return %arg0, %c0_i32 : i32, i32
  }
}

</mosaic_0001>

<bundles_post_ra>
// kernel: swish.1
= control target key start
LH: loop header
LB: loop body
LE: loop exit
PB: predicated region body
PF: predicated region fallthrough
CT: control target
= control target key end

     0   :  { %s52_s0 = inlined_call_operand.vmem [shape: f32[16,128], index: 0, kind: input, shape index: {}]   ;;  %s53_s1 = inlined_call_operand.vmem [shape: f32[16,128], index: 1, kind: output, shape index: {}]  }
   0x1   :  { %v8_v0 = vld [vmem:[%s52_s0] sm:$0xff]  ;;  %v9_v1 = vld [vmem:[%s52_s0 + $0x8] sm:$0xff] }
   0x2   :  { %v10_v2 = vmul.f32 0.5, %v8_v0  ;;  %v11_v3 = vmul.f32 0.5, %v9_v1 }
   0x4   :  { %26 = vtanh.f32 %v10_v2 }
   0x5   :  { %28 = vtanh.f32 %v11_v3 }
   0xe   :  { %v27_v4 = vpop.eup %26 }
   0xf   :  { %v29_v5 = vpop.eup %28  ;;  %v14_v6 = vmul.f32 0.5, %v27_v4 }
  0x10   :  { %v15_v7 = vmul.f32 0.5, %v29_v5 }
  0x11   :  { %v16_v8 = vadd.f32 0.5, %v14_v6 }
  0x12   :  { %v17_v9 = vadd.f32 0.5, %v15_v7 }
  0x13   :  { %v18_v10 = vmul.f32 %v16_v8, %v8_v0 }
  0x14   :  { %v19_v11 = vmul.f32 %v17_v9, %v9_v1 }
  0x15   :  { %20 = vst [vmem:[%s53_s1] sm:$0xff] %v18_v10 }
  0x16   :  { %21 = vst [vmem:[%s53_s1 + $0x8] sm:$0xff] %v19_v11 }

</bundles_post_ra>
